<compile_context>
chip_gen: v7x
topology: tpu7x:2x2x1
jax: 0.10.0
libtpu: 0.0.40
codegen_flags: <defaults>
</compile_context>

<pallas_src>
import functools

import jax
import jax.numpy as jnp
from jax import lax
from jax.experimental import pallas as pl
from jax.experimental.pallas import tpu as pltpu

ALPHA = 0.8
GAMMA = 2

_SUBLANE = 8
_LANE = 128
_MAX_BLOCK_ROWS = 1024   # 1024x128 f32 = 512 KiB per input per pipeline buffer


def _focal_bce_kernel(meta_ref, x_ref, t_ref, part_ref, acc_ref, *, block_rows):
    o = pl.program_id(0)           # "parallel" chunk (megacore split on v7x)
    i = pl.program_id(1)           # "arbitrary" reduction step within chunk
    n_inner = pl.num_programs(1)

    @pl.when(i == 0)
    def _():
        acc_ref[...] = jnp.zeros_like(acc_ref)

    x = x_ref[...].astype(jnp.float32)
    t = t_ref[...].astype(jnp.float32)

    # Softplus-form BCE: 2 EUP ops (exp + log) per element instead of 3.
    # Same -100 clamp semantics as F.binary_cross_entropy on both log terms.
    sp = jnp.maximum(x, 0.0) + jnp.log(1.0 + jnp.exp(-jnp.abs(x)))
    log_p = jnp.maximum(x - sp, -100.0)       # log(sigmoid(x))
    log_1mp = jnp.maximum(-sp, -100.0)        # log(1 - sigmoid(x))
    bce = -(t * log_p + (1.0 - t) * log_1mp)

    # Block validity (scalar): fully-valid blocks skip all mask math.
    blk = o * n_inner + i                      # logical (unclamped) block idx
    start_row = blk * block_rows               # row-level index: no i32 overflow
    nrows_full = meta_ref[0]                   # number of fully-valid 128-lane rows
    tail = meta_ref[1]                         # valid lanes in the partial row
    is_full = (start_row + block_rows) <= nrows_full

    def _fold(v):
        # Fold the block's rows onto the (8,128) vreg accumulator (pure VPU).
        return jnp.sum(v.reshape(block_rows // _SUBLANE, _SUBLANE, _LANE), axis=0)

    @pl.when(is_full)
    def _():
        acc_ref[...] += _fold(bce)

    @pl.when(jnp.logical_not(is_full))
    def _():
        # Tail / re-read blocks only: row+lane comparison (int32-safe) masks
        # out wrapper padding, undefined edge-tile VMEM, and clamped re-reads.
        row_ids = start_row + lax.broadcasted_iota(
            jnp.int32, (block_rows, _LANE), 0)
        lane_ids = lax.broadcasted_iota(jnp.int32, (block_rows, _LANE), 1)
        valid = (row_ids < nrows_full) | ((row_ids == nrows_full)
                                          & (lane_ids < tail))
        acc_ref[...] += _fold(jnp.where(valid, bce, 0.0))

    @pl.when(i == n_inner - 1)
    def _():
        part_ref[0, :, :] = acc_ref[...]


def _num_tensorcores():
    """Best-effort TensorCore count; falls back to 1 (neutral on v5e/v6e)."""
    try:
        info = pltpu.get_tpu_info()
        for name in ("num_tensorcores", "tensorcore_count", "num_cores",
                     "core_count"):
            v = getattr(info, name, None)
            if v:
                return int(v)
    except Exception:
        pass
    try:
        if "v7" in jax.devices()[0].device_kind.lower():
            return 2
    except Exception:
        pass
    return 1


def focal_loss(inputs, targets, alpha=ALPHA, gamma=GAMMA):
    """Pallas TPU implementation of FocalLoss.forward.

    inputs: logits, any shape.  targets: same shape, values in [0, 1].
    Inputs stream in their native dtype (pass bf16 to halve HBM traffic) and
    are upcast to f32 in-kernel.  Returns a float32 scalar.
    """
    x = jnp.asarray(inputs).reshape(-1)
    t = jnp.asarray(targets).reshape(-1)
    n = x.shape[0]

    # Pad only the small tail (< 8*128 elements) so the flat array reshapes to
    # (rows, 128) with rows a multiple of 8.  Padded elements are masked
    # in-kernel (tail block takes the masked branch), so the pad value is moot.
    rem = (-n) % (_SUBLANE * _LANE)
    if rem:
        x = jnp.pad(x, (0, rem))
        t = jnp.pad(t, (0, rem))
    rows = (n + rem) // _LANE
    x2 = x.reshape(rows, _LANE)
    t2 = t.reshape(rows, _LANE)

    block_rows = min(_MAX_BLOCK_ROWS, rows)      # full array if it is small
    nb = pl.cdiv(rows, block_rows)               # total number of blocks
    n_outer = 2 if (nb >= 2 and _num_tensorcores() >= 2) else 1
    n_inner = pl.cdiv(nb, n_outer)

    # Scalar prefetch: [full 128-lane rows, valid lanes in the partial row].
    meta = jnp.array([n // _LANE, n % _LANE], jnp.int32)

    # Clamp so the (at most one) overflow block of the 2-way split re-reads
    # the last valid block; its contribution is masked to zero in-kernel.
    def in_map(o, i, meta_ref):
        return (jnp.minimum(o * n_inner + i, nb - 1), 0)

    if n_inner >= 4:
        # Deeper input pipelining to hide DMA jitter on long reductions.
        tile_spec = pl.BlockSpec((block_rows, _LANE), in_map,
                                 pipeline_mode=pl.Buffered(3))
    else:
        tile_spec = pl.BlockSpec((block_rows, _LANE), in_map)

    kernel = functools.partial(_focal_bce_kernel, block_rows=block_rows)

    partials = pl.pallas_call(
        kernel,
        out_shape=jax.ShapeDtypeStruct((n_outer, _SUBLANE, _LANE), jnp.float32),
        grid_spec=pltpu.PrefetchScalarGridSpec(
            num_scalar_prefetch=1,
            grid=(n_outer, n_inner),
            in_specs=[tile_spec, tile_spec],
            out_specs=pl.BlockSpec((1, _SUBLANE, _LANE),
                                   lambda o, i, meta_ref: (o, 0, 0)),
            scratch_shapes=[pltpu.VMEM((_SUBLANE, _LANE), jnp.float32)],
        ),
        compiler_params=pltpu.CompilerParams(
            dimension_semantics=("parallel", "arbitrary")),
    )(meta, x2, t2)

    # Combine per-core/per-lane partial sums and apply the tiny focal scalar
    # math in the wrapper (4 scalar flops).
    bce_mean = jnp.sum(partials) / jnp.float32(n)
    bce_exp = jnp.exp(-bce_mean)
    return alpha * (1.0 - bce_exp) ** gamma * bce_mean


def _focal_loss_ref(inputs, targets, alpha=ALPHA, gamma=GAMMA):
    # Literal PyTorch-style path: sigmoid -> clamped logs -> mean BCE -> focal.
    p = jax.nn.sigmoid(jnp.asarray(inputs, jnp.float32).reshape(-1))
    t = jnp.asarray(targets, jnp.float32).reshape(-1)
    bce = jnp.mean(-(t * jnp.maximum(jnp.log(p), -100.0)
                     + (1.0 - t) * jnp.maximum(jnp.log(1.0 - p), -100.0)))
    return alpha * (1.0 - jnp.exp(-bce)) ** gamma * bce


if __name__ == "__main__":
    key = jax.random.PRNGKey(0)
    k1, k2 = jax.random.split(key)
    # Small shapes consistent with a segmentation-style use: (N, C, H, W).
    x = jax.random.normal(k1, (2, 4, 16, 16), dtype=jnp.float32)
    targets = jax.random.bernoulli(k2, 0.5, (2, 4, 16, 16)).astype(jnp.float32)

    loss = jax.block_until_ready(focal_loss(x, targets))
    ref = jax.block_until_ready(_focal_loss_ref(x, targets))

    assert jnp.allclose(loss, ref, rtol=3e-5, atol=1e-6), (loss, ref)
    print("KERNEL_OK")
</pallas_src>

<mosaic_0001>
module attributes {stable_mosaic.version = 11 : i64} {
  func.func @_focal_bce_kernel(%arg0: i32, %arg1: i32, %arg2: memref<2xi32, #tpu.memory_space<smem>>, %arg3: memref<16x128xf32, #tpu.memory_space<vmem>>, %arg4: memref<16x128xf32, #tpu.memory_space<vmem>>, %arg5: memref<1x8x128xf32, #tpu.memory_space<vmem>>, %arg6: memref<8x128xf32, #tpu.memory_space<vmem>>) attributes {dimension_semantics = [#tpu.dimension_semantics<parallel>, #tpu.dimension_semantics<arbitrary>], iteration_bounds = array<i64: 1, 1>, scalar_prefetch = 1 : i64, scratch_operands = 1 : i64, tpu.core_type = #tpu.core_type<tc>, window_params = [{transform_indices = @transform_0, window_bounds = array<i64: 16, 128>}, {transform_indices = @transform_1, window_bounds = array<i64: 16, 128>}, {transform_indices = @transform_2, window_bounds = array<i64: 1, 8, 128>}]} {
    %c0_i32 = arith.constant 0 : i32
    %0 = arith.cmpi eq, %arg1, %c0_i32 : i32
    %1 = arith.extui %0 : i1 to i32
    %c0_i32_0 = arith.constant 0 : i32
    %2 = arith.cmpi ne, %1, %c0_i32_0 : i32
    scf.if %2 {
      %cst_17 = arith.constant 0.000000e+00 : f32
      %44 = vector.broadcast %cst_17 : f32 to vector<8x128xf32>
      %c0_18 = arith.constant 0 : index
      %c0_19 = arith.constant 0 : index
      %45 = vector.load %arg6[%c0_18, %c0_19] : memref<8x128xf32, #tpu.memory_space<vmem>>, vector<8x128xf32>
      tpu.vector_store %arg6[%c0_18, %c0_19], %44 {strides = array<i32>} : memref<8x128xf32, #tpu.memory_space<vmem>>, vector<8x128xf32>,
    } else {
    }
    %c0 = arith.constant 0 : index
    %c0_1 = arith.constant 0 : index
    %3 = vector.load %arg3[%c0, %c0_1] : memref<16x128xf32, #tpu.memory_space<vmem>>, vector<16x128xf32>
    %c0_2 = arith.constant 0 : index
    %c0_3 = arith.constant 0 : index
    %4 = vector.load %arg4[%c0_2, %c0_3] : memref<16x128xf32, #tpu.memory_space<vmem>>, vector<16x128xf32>
    %cst = arith.constant 0.000000e+00 : f32
    %5 = vector.broadcast %cst : f32 to vector<16x128xf32>
    %6 = arith.maximumf %3, %5 : vector<16x128xf32>
    %7 = math.absf %3 : vector<16x128xf32>
    %cst_4 = arith.constant 0.000000e+00 : f32
    %8 = vector.broadcast %cst_4 : f32 to vector<16x128xf32>
    %9 = arith.subf %8, %7 : vector<16x128xf32>
    %10 = math.exp %9 : vector<16x128xf32>
    %cst_5 = arith.constant 1.000000e+00 : f32
    %11 = vector.broadcast %cst_5 : f32 to vector<16x128xf32>
    %12 = arith.addf %11, %10 : vector<16x128xf32>
    %13 = math.log %12 : vector<16x128xf32>
    %14 = arith.addf %6, %13 : vector<16x128xf32>
    %15 = arith.subf %3, %14 : vector<16x128xf32>
    %cst_6 = arith.constant -1.000000e+02 : f32
    %16 = vector.broadcast %cst_6 : f32 to vector<16x128xf32>
    %17 = arith.maximumf %15, %16 : vector<16x128xf32>
    %cst_7 = arith.constant 0.000000e+00 : f32
    %18 = vector.broadcast %cst_7 : f32 to vector<16x128xf32>
    %19 = arith.subf %18, %14 : vector<16x128xf32>
    %cst_8 = arith.constant -1.000000e+02 : f32
    %20 = vector.broadcast %cst_8 : f32 to vector<16x128xf32>
    %21 = arith.maximumf %19, %20 : vector<16x128xf32>
    %22 = arith.mulf %4, %17 : vector<16x128xf32>
    %cst_9 = arith.constant 1.000000e+00 : f32
    %23 = vector.broadcast %cst_9 : f32 to vector<16x128xf32>
    %24 = arith.subf %23, %4 : vector<16x128xf32>
    %25 = arith.mulf %24, %21 : vector<16x128xf32>
    %26 = arith.addf %22, %25 : vector<16x128xf32>
    %cst_10 = arith.constant 0.000000e+00 : f32
    %27 = vector.broadcast %cst_10 : f32 to vector<16x128xf32>
    %28 = arith.subf %27, %26 : vector<16x128xf32>
    %c1_i32 = arith.constant 1 : i32
    %29 = arith.muli %arg0, %c1_i32 : i32
    %30 = arith.addi %29, %arg1 : i32
    %c16_i32 = arith.constant 16 : i32
    %31 = arith.muli %30, %c16_i32 : i32
    %c0_11 = arith.constant 0 : index
    %32 = memref.load %arg2[%c0_11] : memref<2xi32, #tpu.memory_space<smem>>
    %c1 = arith.constant 1 : index
    %33 = memref.load %arg2[%c1] : memref<2xi32, #tpu.memory_space<smem>>
    %c16_i32_12 = arith.constant 16 : i32
    %34 = arith.addi %31, %c16_i32_12 : i32
    %35 = arith.cmpi sle, %34, %32 : i32
    %36 = arith.extui %35 : i1 to i32
    %c0_i32_13 = arith.constant 0 : i32
    %37 = arith.cmpi ne, %36, %c0_i32_13 : i32
    scf.if %37 {
      %c0_17 = arith.constant 0 : index
      %c0_18 = arith.constant 0 : index
      %44 = vector.load %arg6[%c0_17, %c0_18] : memref<8x128xf32, #tpu.memory_space<vmem>>, vector<8x128xf32>
      %45 = vector.shape_cast %28 : vector<16x128xf32> to vector<2x8x128xf32>
      %cst_19 = arith.constant dense<0.000000e+00> : vector<8x128xf32>
      %46 = vector.multi_reduction <add>, %45, %cst_19 [0] : vector<2x8x128xf32> to vector<8x128xf32>
      %47 = arith.addf %44, %46 : vector<8x128xf32>
      %c0_20 = arith.constant 0 : index
      %c0_21 = arith.constant 0 : index
      %48 = vector.load %arg6[%c0_20, %c0_21] : memref<8x128xf32, #tpu.memory_space<vmem>>, vector<8x128xf32>
      tpu.vector_store %arg6[%c0_20, %c0_21], %47 {strides = array<i32>} : memref<8x128xf32, #tpu.memory_space<vmem>>, vector<8x128xf32>,
    } else {
    }
    %true = arith.constant true
    %38 = arith.xori %35, %true : i1
    %39 = arith.extui %38 : i1 to i32
    %c0_i32_14 = arith.constant 0 : i32
    %40 = arith.cmpi ne, %39, %c0_i32_14 : i32
    scf.if %40 {
      %44 = tpu.iota {dimensions = array<i32: 0>} : vector<16x128xi32>
      %45 = vector.broadcast %31 : i32 to vector<16x128xi32>
      %46 = arith.addi %45, %44 : vector<16x128xi32>
      %47 = tpu.iota {dimensions = array<i32: 1>} : vector<16x128xi32>
      %48 = vector.broadcast %32 : i32 to vector<16x128xi32>
      %49 = arith.cmpi slt, %46, %48 : vector<16x128xi32>
      %50 = vector.broadcast %32 : i32 to vector<16x128xi32>
      %51 = arith.cmpi eq, %46, %50 : vector<16x128xi32>
      %52 = vector.broadcast %33 : i32 to vector<16x128xi32>
      %53 = arith.cmpi slt, %47, %52 : vector<16x128xi32>
      %54 = arith.andi %51, %53 : vector<16x128xi1>
      %55 = arith.ori %49, %54 : vector<16x128xi1>
      %c0_17 = arith.constant 0 : index
      %c0_18 = arith.constant 0 : index
      %56 = vector.load %arg6[%c0_17, %c0_18] : memref<8x128xf32, #tpu.memory_space<vmem>>, vector<8x128xf32>
      %cst_19 = arith.constant 0.000000e+00 : f32
      %57 = vector.broadcast %cst_19 : f32 to vector<16x128xf32>
      %58 = arith.select %55, %28, %57 : vector<16x128xi1>, vector<16x128xf32>
      %59 = vector.shape_cast %58 : vector<16x128xf32> to vector<2x8x128xf32>
      %cst_20 = arith.constant dense<0.000000e+00> : vector<8x128xf32>
      %60 = vector.multi_reduction <add>, %59, %cst_20 [0] : vector<2x8x128xf32> to vector<8x128xf32>
      %61 = arith.addf %56, %60 : vector<8x128xf32>
      %c0_21 = arith.constant 0 : index
      %c0_22 = arith.constant 0 : index
      %62 = vector.load %arg6[%c0_21, %c0_22] : memref<8x128xf32, #tpu.memory_space<vmem>>, vector<8x128xf32>
      tpu.vector_store %arg6[%c0_21, %c0_22], %61 {strides = array<i32>} : memref<8x128xf32, #tpu.memory_space<vmem>>, vector<8x128xf32>,
    } else {
    }
    %c0_i32_15 = arith.constant 0 : i32
    %41 = arith.cmpi eq, %arg1, %c0_i32_15 : i32
    %42 = arith.extui %41 : i1 to i32
    %c0_i32_16 = arith.constant 0 : i32
    %43 = arith.cmpi ne, %42, %c0_i32_16 : i32
    scf.if %43 {
      %c0_17 = arith.constant 0 : index
      %c0_18 = arith.constant 0 : index
      %44 = vector.load %arg6[%c0_17, %c0_18] : memref<8x128xf32, #tpu.memory_space<vmem>>, vector<8x128xf32>
      %c0_19 = arith.constant 0 : index
      %c0_20 = arith.constant 0 : index
      %c0_21 = arith.constant 0 : index
      %45 = vector.load %arg5[%c0_19, %c0_20, %c0_21] : memref<1x8x128xf32, #tpu.memory_space<vmem>>, vector<1x8x128xf32>
      %46 = vector.shape_cast %45 : vector<1x8x128xf32> to vector<8x128xf32>
      %47 = vector.shape_cast %44 : vector<8x128xf32> to vector<1x8x128xf32>
      tpu.vector_store %arg5[%c0_19, %c0_20, %c0_21], %47 {strides = array<i32>} : memref<1x8x128xf32, #tpu.memory_space<vmem>>, vector<1x8x128xf32>,
    } else {
    }
    return
  }
  func.func @transform_0(%arg0: i32, %arg1: i32, %arg2: memref<2xi32, #tpu.memory_space<smem>>) -> (i32, i32) {
    %c1_i32 = arith.constant 1 : i32
    %0 = arith.muli %arg0, %c1_i32 : i32
    %1 = arith.addi %0, %arg1 : i32
    %c0_i32 = arith.constant 0 : i32
    %2 = arith.minsi %1, %c0_i32 : i32
    %c0_i32_0 = arith.constant 0 : i32
    %c0_i32_1 = arith.constant 0 : i32
    return %2, %c0_i32_0 : i32, i32
  }
  func.func @transform_1(%arg0: i32, %arg1: i32, %arg2: memref<2xi32, #tpu.memory_space<smem>>) -> (i32, i32) {
    %c1_i32 = arith.constant 1 : i32
    %0 = arith.muli %arg0, %c1_i32 : i32
    %1 = arith.addi %0, %arg1 : i32
    %c0_i32 = arith.constant 0 : i32
    %2 = arith.minsi %1, %c0_i32 : i32
    %c0_i32_0 = arith.constant 0 : i32
    %c0_i32_1 = arith.constant 0 : i32
    return %2, %c0_i32_0 : i32, i32
  }
  func.func @transform_2(%arg0: i32, %arg1: i32, %arg2: memref<2xi32, #tpu.memory_space<smem>>) -> (i32, i32, i32) {
    %c0_i32 = arith.constant 0 : i32
    %c0_i32_0 = arith.constant 0 : i32
    %c0_i32_1 = arith.constant 0 : i32
    return %arg0, %c0_i32, %c0_i32_0 : i32, i32, i32
  }
}

</mosaic_0001>

<bundles_post_ra>
// kernel: tpu_custom_call.1
= control target key start
LH: loop header
LB: loop body
LE: loop exit
PB: predicated region body
PF: predicated region fallthrough
CT: control target
= control target key end

     0   :  { %s364_s0 = inlined_call_operand.hbm [shape: s32[2], index: 0, kind: input, shape index: {}]   ;;  %s365_s1 = inlined_call_operand.hbm [shape: f32[16,128], index: 1, kind: input, shape index: {}]   ;;  %s366_s2 = inlined_call_operand.hbm [shape: f32[16,128], index: 2, kind: input, shape index: {}]   ;;  %s367_s3 = inlined_call_operand.hbm [shape: f32[1,8,128], index: 3, kind: output, shape index: {}]  }
   0x1   :  { %s197_s14 = scalar_lea.hbm %s364_s0, 16 }
   0x2   :  { %p198_p0 = scmp.ne.s32.totalorder %s364_s0, %s197_s14  ;;  %p201_p1 = scmp.lt.u32.totalorder %s197_s14, %s364_s0 }
   0x4   :  { %p203_p2 = pnand %p201_p1, %p198_p0 }
   0x6   :  { %206 = shalt.err (!%p203_p2)  }
   0x7   :  { %s281_s19 = smov [#allocation4]  }
   0x8   :  { %9 = dma.hbm_to_smem %s364_s0, 16, %s281_s19, [#allocation3] }
   0x9   :  { %273 = dma.done.wait [#allocation3], 16 }
   0xa   :  { %274 = vsyncadd [#allocation3], 4294967280 }
   0xb   :  { %11 = sfence }
   0xc   :  { %12 = vsyncpa [#allocation6], 0 }
   0xd   :  { %13 = vsyncpa [#allocation9], 0 }
   0xe   :  { %14 = vsyncpa [#allocation7], 0  ;;  %s282_s22 = smov [#allocation5]   ;;  %s207_s26 = scalar_lea.hbm %s365_s1, 256 }
   0xf   :  { %s26_s23 = sshll.u32 %s282_s22, 4  ;;  %p208_p3 = scmp.ne.s32.totalorder %s365_s1, %s207_s26  ;;  %s27_s23 = int_to_ptr.vmem [resolvable:$true] %s26_s23 }
  0x10   :  { %p211_p4 = scmp.lt.u32.totalorder %s207_s26, %s365_s1 }
  0x12   :  { %p213_p5 = pnand %p211_p4, %p208_p3 }
  0x14   :  { %216 = shalt.err (!%p213_p5)
}
  0x15   :  { %s217_s0 = scalar_lea.vmem %s27_s23, 256  ;;  %p222_p7 = scmp.lt.s32.totalorder %s27_s23, %s27_s23 }
  0x16   :  { %p218_p6 = scmp.ne.s32.totalorder %s27_s23, %s217_s0  ;;  %p223_p8 = scmp.lt.s32.totalorder %s217_s0, %s217_s0 }
  0x18   :  { %p224_p9 = por %p223_p8, %p222_p7 }
  0x1a   :  { %p225_p10 = pnand %p224_p9, %p218_p6 }
  0x1c   :  { %228 = shalt.err (!%p225_p10)
}
  0x1d   :  { %s283_s4 = smov 128   ;;  %s284_s5 = smov 8  }
  0x1e   :  { %32 = dma.hbm_to_vmem [thread:$0]  %s365_s1, 256, %s27_s23, [#allocation6], %s283_s4, %s283_s4, %s284_s5  }
  0x1f   :  { %s285_s8 = smov [#allocation8]   ;;  %s229_s12 = scalar_lea.hbm %s366_s2, 256 }
  0x20   :  { %s44_s9 = sshll.u32 %s285_s8, 4  ;;  %p230_p11 = scmp.ne.s32.totalorder %s366_s2, %s229_s12  ;;  %s45_s9 = int_to_ptr.vmem [resolvable:$true] %s44_s9 }
  0x21   :  { %p233_p12 = scmp.lt.u32.totalorder %s229_s12, %s366_s2 }
  0x23   :  { %p235_p13 = pnand %p233_p12, %p230_p11 }
  0x25   :  { %238 = shalt.err (!%p235_p13)
}
  0x26   :  { %s239_s17 = scalar_lea.vmem %s45_s9, 256  ;;  %p244_p1 = scmp.lt.s32.totalorder %s45_s9, %s45_s9 }
  0x27   :  { %p240_p0 = scmp.ne.s32.totalorder %s45_s9, %s239_s17  ;;  %p245_p2 = scmp.lt.s32.totalorder %s239_s17, %s239_s17 }
  0x29   :  { %p246_p3 = por %p245_p2, %p244_p1 }
  0x2b   :  { %p247_p4 = pnand %p246_p3, %p240_p0 }
  0x2d   :  { %250 = shalt.err (!%p247_p4)
}
  0x2e   :  { %50 = dma.hbm_to_vmem [thread:$0]  %s366_s2, 256, %s45_s9, [#allocation9], %s283_s4, %s283_s4, %s284_s5  }
  0x2f   :  { %275 = dma.done.wait [#allocation6], 256  }
  0x30   :  { %276 = vsyncadd [#allocation6], 4294967040 }
  0x31   :  { %277 = dma.done.wait [#allocation9], 256  }
  0x32   :  { %278 = vsyncadd [#allocation9], 4294967040  ;;  %s344_s19 = sld [smem:[#allocation4]]  ;;  %s346_s20 = sld [smem:[#allocation4 + $0x1]]  ;;  %v286_v0 = vmov 0.0   ;;  %v70_v1 = vld [vmem:[#allocation5] sm:$0xff] }
  0x33   :  { %69 = vst [vmem:[#allocation2] sm:$0xff] %v286_v0  ;;  %v71_v2 = vld [vmem:[#allocation5 + $0x8] sm:$0xff]  ;;  %v76_v3 = vand.u32 2147483647, %v70_v1  ;;  %v74_v13 = vmax.f32 %v70_v1, 0.0  ;;  %v72_v18 = vld [vmem:[#allocation8] sm:$0xff] }
  0x34   :  { %v77_v4 = vand.u32 2147483647, %v71_v2  ;;  %v75_v15 = vmax.f32 %v71_v2, 0.0  ;;  %v73_v20 = vld [vmem:[#allocation8 + $0x8] sm:$0xff]  ;;  %v102_v25 = vsub.f32 1.0, %v72_v18 }
  0x35   :  { %v78_v5 = vsub.f32 0.0, %v76_v3  ;;  %v103_v28 = vsub.f32 1.0, %v73_v20 }
  0x36   :  { %v79_v6 = vsub.f32 0.0, %v77_v4 }
  0x37   :  { %v80_v7 = vmul.f32 1.442695, %v78_v5 }
  0x38   :  { %v82_v8 = vmul.f32 1.442695, %v79_v6  ;;  %p179_p5 = scmp.lt.s32.totalorder %s344_s19, 16 }
  0x39   :  { %189 = vpow2.f32 %v80_v7 }
  0x3a   :  { %191 = vpow2.f32 %v82_v8  ;;  %v119_v41 = vld [vmem:[#allocation2] sm:$0xff] (!%p179_p5) }
  0x43   :  { %v190_v9 = vpop.eup %189 }
  0x44   :  { %v192_v10 = vpop.eup %191  ;;  %v84_v11 = vadd.f32 1.0, %v190_v9 }
  0x45   :  { %v85_v12 = vadd.f32 1.0, %v192_v10 }
  0x46   :  { %193 = vlog2.f32 %v84_v11 }
  0x47   :  { %195 = vlog2.f32 %v85_v12 }
  0x50   :  { %v194_v14 = vpop.eup %193 }
  0x51   :  { %v196_v16 = vpop.eup %195  ;;  %v87_v17 = vmul.f32 0.6931472, %v194_v14 }
  0x52   :  { %v89_v19 = vmul.f32 0.6931472, %v196_v16 }
  0x53   :  { %v90_v21 = vadd.f32 %v87_v17, %v74_v13 }
  0x54   :  { %v91_v22 = vadd.f32 %v89_v19, %v75_v15 }
  0x55   :  { %v92_v23 = vsub.f32 %v70_v1, %v90_v21  ;;  %v96_v24 = vsub.f32 0.0, %v90_v21 }
  0x56   :  { %v93_v26 = vsub.f32 %v71_v2, %v91_v22  ;;  %v97_v27 = vsub.f32 0.0, %v91_v22 }
  0x57   :  { %v94_v29 = vmax.f32 %v92_v23, -100.0  ;;  %v98_v30 = vmax.f32 %v96_v24, -100.0 }
  0x58   :  { %v95_v31 = vmax.f32 %v93_v26, -100.0  ;;  %v99_v32 = vmax.f32 %v97_v27, -100.0  ;;  %118 = sbr.rel (%p179_p5) target bundleno = 101 (0x65), region = 25 }
  0x59   :  { %v100_v33 = vmul.f32 %v94_v29, %v72_v18  ;;  %v104_v34 = vmul.f32 %v102_v25, %v98_v30 }
  0x5a   :  { %v101_v35 = vmul.f32 %v95_v31, %v73_v20  ;;  %v105_v36 = vmul.f32 %v103_v28, %v99_v32 }
  0x5b   :  { %v106_v37 = vadd.f32 %v104_v34, %v100_v33 }
  0x5c   :  { %v107_v38 = vadd.f32 %v105_v36, %v101_v35 }
  0x5d   :  { %v108_v39 = vsub.f32 0.0, %v106_v37 }
  0x5e   :  { %v109_v40 = vsub.f32 0.0, %v107_v38 }
  0x60   :  { %v120_v42 = vadd.f32 %v109_v40, %v108_v39 }
  0x62   :  { %v121_v43 = vadd.f32 %v120_v42, %v119_v41 }
  0x64   :  { %122 = vst [vmem:[#allocation2] sm:$0xff] %v121_v43 }
  0x65 PF:  { %p181_p6 = scmp.ge.s32.totalorder %s344_s19, 16 }
  0x66   :  { %v127_v44 = vlaneseq (!%p181_p6)  ;;  %v135_v45 = vstv (!%p181_p6), %s344_s19  ;;  %v140_v46 = vstv (!%p181_p6), %s346_s20 }
  0x67   :  { %126 = sbr.rel (%p181_p6) target bundleno = 117 (0x75), region = 29 }
  0x68   :  { %v128_v47 = vshrl.u32 (!%p181_p6), %v127_v44, 7  ;;  %v134_v48 = vand.u32 (!%p181_p6), 127, %v127_v44 }
  0x6a   :  { %v129_v49 = vadd.s32 (!%p181_p6), 8, %v128_v47  ;;  %vm136_vm0 = vcmp.lt.s32.totalorder (!%p181_p6), %v128_v47, %v135_v45  ;;  %vm138_vm1 = vcmp.eq.s32.totalorder (!%p181_p6), %v128_v47, %v135_v45  ;;  %vm141_vm2 = vcmp.lt.s32.totalorder (!%p181_p6), %v134_v48, %v140_v46 }
  0x6b   :  { %vm142_vm3 = vmand (!%p181_p6), %vm138_vm1, %vm141_vm2  ;;  %v146_v51 = vld [vmem:[#allocation2] sm:$0xff] (!%p181_p6) }
  0x6c   :  { %vm137_vm4 = vcmp.lt.s32.totalorder (!%p181_p6), %v129_v49, %v135_v45  ;;  %vm139_vm5 = vcmp.eq.s32.totalorder (!%p181_p6), %v129_v49, %v135_v45  ;;  %vm144_vm6 = vmor (!%p181_p6), %vm136_vm0, %vm142_vm3 }
  0x6d   :  { %vm143_vm7 = vmand (!%p181_p6), %vm139_vm5, %vm141_vm2  ;;  %v147_v50 = vsel (!%p181_p6), %vm144_vm6, %v108_v39, 0.0 }
  0x6e   :  { %vm145_vm8 = vmor %vm137_vm4, %vm143_vm7 }
  0x6f   :  { %v148_v52 = vsel %vm145_vm8, %v109_v40, 0.0 }
  0x70   :  { %v149_v53 = vadd.f32 %v148_v52, %v147_v50 }
  0x72   :  { %v150_v54 = vadd.f32 %v149_v53, %v146_v51 }
  0x74   :  { %151 = vst [vmem:[#allocation2] sm:$0xff] %v150_v54 }
  0x75 PF:  { %s287_s2 = smov [#allocation10]  }
  0x76   :  { %s163_s21 = sshll.u32 %s287_s2, 4  ;;  %s164_s21 = int_to_ptr.vmem [resolvable:$true] %s163_s21 }
  0x77   :  { %s251_s22 = scalar_lea.vmem %s164_s21, 128  ;;  %p256_p8 = scmp.lt.s32.totalorder %s164_s21, %s164_s21 }
  0x78   :  { %p252_p7 = scmp.ne.s32.totalorder %s164_s21, %s251_s22  ;;  %p257_p9 = scmp.lt.s32.totalorder %s251_s22, %s251_s22 }
  0x7a   :  { %p258_p10 = por %p257_p9, %p256_p8 }
  0x7b   :  { %v155_v55 = vld [vmem:[#allocation2] sm:$0xff] }
  0x7c   :  { %156 = vst [vmem:[#allocation10] sm:$0xff] %v155_v55  ;;  %p259_p11 = pnand %p258_p10, %p252_p7 }
  0x7e   :  { %262 = shalt.err (!%p259_p11)
}
  0x7f   :  { %s263_s25 = scalar_lea.hbm %s367_s3, 128 }
  0x80   :  { %p264_p12 = scmp.ne.s32.totalorder %s367_s3, %s263_s25  ;;  %p267_p13 = scmp.lt.u32.totalorder %s263_s25, %s367_s3 }
  0x82   :  { %p269_p0 = pnand %p267_p13, %p264_p12 }
  0x84   :  { %272 = shalt.err (!%p269_p0)
}
  0x85   :  { %166 = dma.vmem_to_hbm [thread:$0]  %s164_s21, 128, %s367_s3, [#allocation7]  }
  0x86   :  { %279 = dma.done.wait [#allocation7], 128  }
  0x87   :  { %280 = vsyncadd [#allocation7], 4294967168 }
  0x88   :  { %170 = vsyncpa [#allocation6], 1 }
  0x89   :  { %171 = vsyncpa [#allocation9], 1 }
  0x8a   :  { %172 = vsyncpa [#allocation7], 1 }

</bundles_post_ra>
